<compile_context>
chip_gen: v7x
topology: tpu7x:2x2x1
jax: 0.10.0
libtpu: 0.0.40
codegen_flags: <defaults>
</compile_context>

<pallas_src>
import functools

import jax
import jax.numpy as jnp
from jax.experimental import pallas as pl
from jax.experimental.pallas import tpu as pltpu


def _round_up(a, m):
    return (a + m - 1) // m * m


def _pick_batch_tile(B, max_tile=8):
    """Largest divisor of B (<= max_tile) that still leaves >=2 grid steps (v7x megacore)."""
    best = 1
    for bt in range(1, min(B, max_tile) + 1):
        if B % bt == 0 and (B // bt >= 2 or B == 1):
            best = bt
    return best


def _textcnn_kernel(xp_ref, wall_ref, wm_ref, bias_ref, word_ref, txt_ref,
                    *, L, Epad, Bt, Lc8):
    f32 = jnp.float32
    Lp8 = xp_ref.shape[1]
    H = xp_ref.shape[2]

    # --- one fused tap matmul: (Bt*Lp8, H) @ (H, 7*Epad), f32 accumulation ---
    xp = xp_ref[...].reshape(Bt * Lp8, H)                      # bf16
    z = jnp.dot(xp, wall_ref[...], preferred_element_type=f32)  # (Bt*Lp8, 7*Epad)
    z = z.reshape(Bt, Lp8, 7 * Epad)

    bfc = bias_ref[0:1, :]
    b1 = bias_ref[1:2, :]
    b2 = bias_ref[2:3, :]
    b3 = bias_ref[3:4, :]
    bm = bias_ref[4:5, :]

    def seg(i, lo, hi):
        # tap i of the fused matmul, shifted window [lo, hi) along the sequence axis
        return z[:, lo:hi, i * Epad:(i + 1) * Epad]             # (Bt, L, Epad)

    # fc / conv K=1 (input rows 1..L of the padded sequence)
    xe = seg(0, 1, L + 1) + bfc
    x1 = jnp.maximum(seg(1, 1, L + 1) + b1, 0.0)
    # conv K=2: F.pad(x, (0,0,0,1)) -> taps at rows l+1, l+2
    x2 = jnp.maximum(seg(2, 1, L + 1) + seg(3, 2, L + 2) + b2, 0.0)
    # conv K=3: F.pad(x, (0,0,1,1)) -> taps at rows l, l+1, l+2
    x3 = jnp.maximum(seg(4, 0, L) + seg(5, 1, L + 1) + seg(6, 2, L + 2) + b3, 0.0)

    # --- fold the pooled (txt) row into the word mapping matmul ---
    p1 = jnp.max(x1, axis=1, keepdims=True)                    # (Bt, 1, Epad)
    p2 = jnp.max(x2, axis=1, keepdims=True)
    p3 = jnp.max(x3, axis=1, keepdims=True)

    fill = []
    if Lc8 > L + 1:   # sublane-align the row count so the reshape is tile-friendly (Bt > 1)
        fill = [jnp.zeros((Bt, Lc8 - (L + 1), Epad), f32)]
    c1 = jnp.concatenate([x1, p1] + fill, axis=1)               # (Bt, Lc8, Epad)
    c2 = jnp.concatenate([x2, p2] + fill, axis=1)
    c3 = jnp.concatenate([x3, p3] + fill, axis=1)
    cat = jnp.concatenate([c1, c2, c3], axis=2).astype(wm_ref.dtype)   # (Bt, Lc8, 3*Epad)

    mapped = jnp.dot(cat.reshape(Bt * Lc8, 3 * Epad), wm_ref[...],
                     preferred_element_type=f32)                # (Bt*Lc8, Epad)
    mapped = mapped.reshape(Bt, Lc8, Epad) + bm

    word_ref[...] = (mapped[:, :L] + xe).astype(word_ref.dtype)
    txt_ref[...] = (mapped[:, L:L + 1]
                    + jnp.mean(xe, axis=1, keepdims=True)).astype(txt_ref.dtype)


@functools.partial(jax.jit, static_argnames=("L", "Epad", "Bt", "Lp8", "Lc8"))
def _textcnn_pallas(x, wall, wm, bias, *, L, Epad, Bt, Lp8, Lc8):
    B, _, H = x.shape
    # zero-pad the sequence axis: 1 leading zero row + trailing zeros up to Lp8
    xpad = jnp.pad(x.astype(jnp.bfloat16), ((0, 0), (1, Lp8 - (L + 1)), (0, 0)))

    kernel = functools.partial(_textcnn_kernel, L=L, Epad=Epad, Bt=Bt, Lc8=Lc8)
    grid = (B // Bt,)

    word, txt = pl.pallas_call(
        kernel,
        grid=grid,
        in_specs=[
            pl.BlockSpec((Bt, Lp8, H), lambda i: (i, 0, 0)),        # xpad
            pl.BlockSpec((H, 7 * Epad), lambda i: (0, 0)),          # fused tap weights (bf16)
            pl.BlockSpec((3 * Epad, Epad), lambda i: (0, 0)),       # mapping weight (bf16)
            pl.BlockSpec((8, Epad), lambda i: (0, 0)),              # stacked biases (f32)
        ],
        out_specs=(
            pl.BlockSpec((Bt, L, Epad), lambda i: (i, 0, 0)),       # word_emb (padded to Epad)
            pl.BlockSpec((Bt, 1, Epad), lambda i: (i, 0, 0)),       # txt_emb  (padded to Epad)
        ),
        out_shape=(
            jax.ShapeDtypeStruct((B, L, Epad), jnp.float32),
            jax.ShapeDtypeStruct((B, 1, Epad), jnp.float32),
        ),
        compiler_params=pltpu.CompilerParams(
            dimension_semantics=("parallel",)),
    )(xpad, wall, wm, bias)
    return word, txt


def prepare_params(params):
    """One-time parameter re-layout (hoisted out of the forward pass)."""
    E, H = params["wfc"].shape
    Epad = _round_up(E, 128)
    bf16 = jnp.bfloat16

    def pad_cols(w):                                   # (H, E) -> (H, Epad)
        return jnp.pad(w, ((0, 0), (0, Epad - E)))

    taps = [
        params["wfc"].T,                               # fc
        params["w1"][:, 0, 0, :].T,                    # conv K=1
        params["w2"][:, 0, 0, :].T,                    # conv K=2 taps
        params["w2"][:, 0, 1, :].T,
        params["w3"][:, 0, 0, :].T,                    # conv K=3 taps
        params["w3"][:, 0, 1, :].T,
        params["w3"][:, 0, 2, :].T,
    ]
    wall = jnp.concatenate([pad_cols(t) for t in taps], axis=1).astype(bf16)   # (H, 7*Epad)

    wmT = params["wmap"].T                             # (3E, E)
    wm = jnp.zeros((3 * Epad, Epad), jnp.float32)
    for i in range(3):
        wm = wm.at[i * Epad:i * Epad + E, :E].set(wmT[i * E:(i + 1) * E, :])
    wm = wm.astype(bf16)                               # (3*Epad, Epad)

    bias = jnp.zeros((8, Epad), jnp.float32)           # rows: bfc, b1, b2, b3, bmap
    for r, name in enumerate(["bfc", "b1", "b2", "b3", "bmap"]):
        bias = bias.at[r, :E].set(params[name])

    return {"wall": wall, "wm": wm, "bias": bias, "E": E, "H": H, "Epad": Epad}


def textcnn_forward(x, prep, *, batch_tile=None):
    """x: (B, L, H) float32.  Returns (word_emb (B, L, E), txt_emb (B, E)), float32."""
    B, L, H = x.shape
    E, Epad = prep["E"], prep["Epad"]
    Bt = batch_tile if batch_tile is not None else _pick_batch_tile(B)
    assert B % Bt == 0
    Lp8 = _round_up(L + 2, 8)
    Lc8 = (L + 1) if Bt == 1 else _round_up(L + 1, 8)

    word_pad, txt_pad = _textcnn_pallas(x, prep["wall"], prep["wm"], prep["bias"],
                                        L=L, Epad=Epad, Bt=Bt, Lp8=Lp8, Lc8=Lc8)
    return word_pad[:, :, :E], txt_pad[:, 0, :E]


def init_params(key, bert_hid, embed_size):
    H, E = bert_hid, embed_size
    ks = jax.random.split(key, 10)
    s = 0.05
    return {
        "wfc": s * jax.random.normal(ks[0], (E, H), jnp.float32),
        "bfc": s * jax.random.normal(ks[1], (E,), jnp.float32),
        "w1": s * jax.random.normal(ks[2], (E, 1, 1, H), jnp.float32),
        "b1": s * jax.random.normal(ks[3], (E,), jnp.float32),
        "w2": s * jax.random.normal(ks[4], (E, 1, 2, H), jnp.float32),
        "b2": s * jax.random.normal(ks[5], (E,), jnp.float32),
        "w3": s * jax.random.normal(ks[6], (E, 1, 3, H), jnp.float32),
        "b3": s * jax.random.normal(ks[7], (E,), jnp.float32),
        "wmap": s * jax.random.normal(ks[8], (E, 3 * E), jnp.float32),
        "bmap": s * jax.random.normal(ks[9], (E,), jnp.float32),
    }


def ref_forward(x, P):
    """Pure-JAX mirror of the PyTorch forward (f32, HIGHEST precision)."""
    B, L, H = x.shape
    hp = jax.lax.Precision.HIGHEST
    xe = jnp.einsum("blh,eh->ble", x, P["wfc"], precision=hp) + P["bfc"]
    xp = jnp.pad(x, ((0, 0), (1, 1), (0, 0)))

    def conv(w, b, K, start):
        y = sum(jnp.einsum("blh,eh->ble", xp[:, start + k:start + k + L], w[:, 0, k],
                           precision=hp)
                for k in range(K)) + b
        return jnp.maximum(y, 0.0)                               # (B, L, E)

    x1 = conv(P["w1"], P["b1"], 1, 1)
    x2 = conv(P["w2"], P["b2"], 2, 1)
    x3 = conv(P["w3"], P["b3"], 3, 0)
    cat = jnp.concatenate([x1, x2, x3], axis=-1)                 # (B, L, 3E)
    word = jnp.einsum("blf,ef->ble", cat, P["wmap"], precision=hp) + P["bmap"] + xe
    pooled = jnp.concatenate([x1.max(1), x2.max(1), x3.max(1)], axis=-1)
    txt = jnp.einsum("bf,ef->be", pooled, P["wmap"], precision=hp) + P["bmap"] + xe.mean(1)
    return word, txt


if __name__ == "__main__":
    B, L = 2, 8            # batch, sequence length
    bert_hid = 32          # args.bert_hid
    embed_size = 32        # args.embed_size

    key = jax.random.PRNGKey(0)
    kx, kp = jax.random.split(key)
    x = jax.random.normal(kx, (B, L, bert_hid), jnp.float32)
    params = init_params(kp, bert_hid, embed_size)

    prep = prepare_params(params)                      # one-time weight re-layout
    word_emb, txt_emb = textcnn_forward(x, prep)
    jax.block_until_ready((word_emb, txt_emb))

    assert word_emb.shape == (B, L, embed_size)
    assert txt_emb.shape == (B, embed_size)

    # Tight check: reference evaluated at the same bf16-rounded x / matmul weights the
    # kernel consumes (isolates kernel semantics from bf16 input quantization).
    rb = lambda a: a.astype(jnp.bfloat16).astype(jnp.float32)
    Pq = dict(params)
    for k in ("wfc", "w1", "w2", "w3", "wmap"):
        Pq[k] = rb(params[k])
    word_q, txt_q = ref_forward(rb(x), Pq)
    assert jnp.allclose(word_emb, word_q, atol=1e-2, rtol=1e-2)
    assert jnp.allclose(txt_emb, txt_q, atol=1e-2, rtol=1e-2)

    # Loose check against the full-f32 reference (covers bf16 quantization error too).
    word_f, txt_f = ref_forward(x, params)
    assert jnp.allclose(word_emb, word_f, atol=5e-2, rtol=5e-2)
    assert jnp.allclose(txt_emb, txt_f, atol=5e-2, rtol=5e-2)

    print("KERNEL_OK")
</pallas_src>

<mosaic_0001>
module attributes {stable_mosaic.version = 11 : i64} {
  func.func @_textcnn_kernel(%arg0: i32, %arg1: memref<1x16x32xbf16, #tpu.memory_space<vmem>>, %arg2: memref<32x896xbf16, #tpu.memory_space<vmem>>, %arg3: memref<384x128xbf16, #tpu.memory_space<vmem>>, %arg4: memref<8x128xf32, #tpu.memory_space<vmem>>, %arg5: memref<1x8x128xf32, #tpu.memory_space<vmem>>, %arg6: memref<1x1x128xf32, #tpu.memory_space<vmem>>) attributes {dimension_semantics = [#tpu.dimension_semantics<parallel>], iteration_bounds = array<i64: 2>, scalar_prefetch = 0 : i64, scratch_operands = 0 : i64, tpu.core_type = #tpu.core_type<tc>, window_params = [{transform_indices = @transform_0, window_bounds = array<i64: 1, 16, 32>}, {pipeline_mode = #tpu.pipeline_mode<synchronous>, transform_indices = @transform_1, window_bounds = array<i64: 32, 896>}, {pipeline_mode = #tpu.pipeline_mode<synchronous>, transform_indices = @transform_2, window_bounds = array<i64: 384, 128>}, {pipeline_mode = #tpu.pipeline_mode<synchronous>, transform_indices = @transform_3, window_bounds = array<i64: 8, 128>}, {transform_indices = @transform_4, window_bounds = array<i64: 1, 8, 128>}, {transform_indices = @transform_5, window_bounds = array<i64: 1, 1, 128>}]} {
    %c0 = arith.constant 0 : index
    %c0_0 = arith.constant 0 : index
    %c0_1 = arith.constant 0 : index
    %0 = vector.load %arg1[%c0, %c0_0, %c0_1] : memref<1x16x32xbf16, #tpu.memory_space<vmem>>, vector<1x16x32xbf16>
    %1 = vector.shape_cast %0 : vector<1x16x32xbf16> to vector<16x32xbf16>
    %c0_2 = arith.constant 0 : index
    %c0_3 = arith.constant 0 : index
    %2 = vector.load %arg2[%c0_2, %c0_3] : memref<32x896xbf16, #tpu.memory_space<vmem>>, vector<32x896xbf16>
    %cst = arith.constant dense<0.000000e+00> : vector<16x896xf32>
    %3 = tpu.matmul %1, %2, %cst {dimension_numbers = #tpu.dot_dimension_numbers<[1], [0], [0], [1], [0, 0, 1, 1], [], []>} : vector<16x32xbf16>, vector<32x896xbf16>, vector<16x896xf32> -> vector<16x896xf32>
    %4 = vector.shape_cast %3 : vector<16x896xf32> to vector<1x16x896xf32>
    %c0_4 = arith.constant 0 : index
    %c0_5 = arith.constant 0 : index
    %5 = vector.load %arg4[%c0_4, %c0_5] : memref<8x128xf32, #tpu.memory_space<vmem>>, vector<1x128xf32>
    %c1 = arith.constant 1 : index
    %c0_6 = arith.constant 0 : index
    %6 = vector.load %arg4[%c1, %c0_6] : memref<8x128xf32, #tpu.memory_space<vmem>>, vector<1x128xf32>
    %c2 = arith.constant 2 : index
    %c0_7 = arith.constant 0 : index
    %7 = vector.load %arg4[%c2, %c0_7] : memref<8x128xf32, #tpu.memory_space<vmem>>, vector<1x128xf32>
    %c3 = arith.constant 3 : index
    %c0_8 = arith.constant 0 : index
    %8 = vector.load %arg4[%c3, %c0_8] : memref<8x128xf32, #tpu.memory_space<vmem>>, vector<1x128xf32>
    %c4 = arith.constant 4 : index
    %c0_9 = arith.constant 0 : index
    %9 = vector.load %arg4[%c4, %c0_9] : memref<8x128xf32, #tpu.memory_space<vmem>>, vector<1x128xf32>
    %10 = vector.extract_strided_slice %4 {offsets = [0, 1, 0], sizes = [1, 8, 128], strides = [1, 1, 1]} : vector<1x16x896xf32> to vector<1x8x128xf32>
    %11 = vector.shape_cast %5 : vector<1x128xf32> to vector<1x1x128xf32>
    %12 = vector.broadcast %11 : vector<1x1x128xf32> to vector<1x8x128xf32>
    %13 = arith.addf %10, %12 : vector<1x8x128xf32>
    %14 = vector.extract_strided_slice %4 {offsets = [0, 1, 128], sizes = [1, 8, 128], strides = [1, 1, 1]} : vector<1x16x896xf32> to vector<1x8x128xf32>
    %15 = vector.shape_cast %6 : vector<1x128xf32> to vector<1x1x128xf32>
    %16 = vector.broadcast %15 : vector<1x1x128xf32> to vector<1x8x128xf32>
    %17 = arith.addf %14, %16 : vector<1x8x128xf32>
    %cst_10 = arith.constant 0.000000e+00 : f32
    %18 = vector.broadcast %cst_10 : f32 to vector<1x8x128xf32>
    %19 = arith.maximumf %17, %18 : vector<1x8x128xf32>
    %20 = vector.extract_strided_slice %4 {offsets = [0, 1, 256], sizes = [1, 8, 128], strides = [1, 1, 1]} : vector<1x16x896xf32> to vector<1x8x128xf32>
    %21 = vector.extract_strided_slice %4 {offsets = [0, 2, 384], sizes = [1, 8, 128], strides = [1, 1, 1]} : vector<1x16x896xf32> to vector<1x8x128xf32>
    %22 = arith.addf %20, %21 : vector<1x8x128xf32>
    %23 = vector.shape_cast %7 : vector<1x128xf32> to vector<1x1x128xf32>
    %24 = vector.broadcast %23 : vector<1x1x128xf32> to vector<1x8x128xf32>
    %25 = arith.addf %22, %24 : vector<1x8x128xf32>
    %cst_11 = arith.constant 0.000000e+00 : f32
    %26 = vector.broadcast %cst_11 : f32 to vector<1x8x128xf32>
    %27 = arith.maximumf %25, %26 : vector<1x8x128xf32>
    %28 = vector.extract_strided_slice %4 {offsets = [0, 0, 512], sizes = [1, 8, 128], strides = [1, 1, 1]} : vector<1x16x896xf32> to vector<1x8x128xf32>
    %29 = vector.extract_strided_slice %4 {offsets = [0, 1, 640], sizes = [1, 8, 128], strides = [1, 1, 1]} : vector<1x16x896xf32> to vector<1x8x128xf32>
    %30 = arith.addf %28, %29 : vector<1x8x128xf32>
    %31 = vector.extract_strided_slice %4 {offsets = [0, 2, 768], sizes = [1, 8, 128], strides = [1, 1, 1]} : vector<1x16x896xf32> to vector<1x8x128xf32>
    %32 = arith.addf %30, %31 : vector<1x8x128xf32>
    %33 = vector.shape_cast %8 : vector<1x128xf32> to vector<1x1x128xf32>
    %34 = vector.broadcast %33 : vector<1x1x128xf32> to vector<1x8x128xf32>
    %35 = arith.addf %32, %34 : vector<1x8x128xf32>
    %cst_12 = arith.constant 0.000000e+00 : f32
    %36 = vector.broadcast %cst_12 : f32 to vector<1x8x128xf32>
    %37 = arith.maximumf %35, %36 : vector<1x8x128xf32>
    %cst_13 = arith.constant dense<0xFF800000> : vector<1x128xf32>
    %38 = vector.multi_reduction <maximumf>, %19, %cst_13 [1] : vector<1x8x128xf32> to vector<1x128xf32>
    %39 = vector.shape_cast %38 : vector<1x128xf32> to vector<1x1x128xf32>
    %cst_14 = arith.constant dense<0xFF800000> : vector<1x128xf32>
    %40 = vector.multi_reduction <maximumf>, %27, %cst_14 [1] : vector<1x8x128xf32> to vector<1x128xf32>
    %41 = vector.shape_cast %40 : vector<1x128xf32> to vector<1x1x128xf32>
    %cst_15 = arith.constant dense<0xFF800000> : vector<1x128xf32>
    %42 = vector.multi_reduction <maximumf>, %37, %cst_15 [1] : vector<1x8x128xf32> to vector<1x128xf32>
    %43 = vector.shape_cast %42 : vector<1x128xf32> to vector<1x1x128xf32>
    %44 = tpu.concatenate %19, %39 in 1 : vector<1x8x128xf32>, vector<1x1x128xf32> -> vector<1x9x128xf32>
    %45 = tpu.concatenate %27, %41 in 1 : vector<1x8x128xf32>, vector<1x1x128xf32> -> vector<1x9x128xf32>
    %46 = tpu.concatenate %37, %43 in 1 : vector<1x8x128xf32>, vector<1x1x128xf32> -> vector<1x9x128xf32>
    %47 = tpu.concatenate %44, %45, %46 in 2 : vector<1x9x128xf32>, vector<1x9x128xf32>, vector<1x9x128xf32> -> vector<1x9x384xf32>
    %48 = arith.truncf %47 : vector<1x9x384xf32> to vector<1x9x384xbf16>
    %49 = vector.shape_cast %48 : vector<1x9x384xbf16> to vector<9x384xbf16>
    %c0_16 = arith.constant 0 : index
    %c0_17 = arith.constant 0 : index
    %50 = vector.load %arg3[%c0_16, %c0_17] : memref<384x128xbf16, #tpu.memory_space<vmem>>, vector<384x128xbf16>
    %cst_18 = arith.constant dense<0.000000e+00> : vector<9x128xf32>
    %51 = tpu.matmul %49, %50, %cst_18 {dimension_numbers = #tpu.dot_dimension_numbers<[1], [0], [0], [1], [0, 0, 1, 1], [], []>} : vector<9x384xbf16>, vector<384x128xbf16>, vector<9x128xf32> -> vector<9x128xf32>
    %52 = vector.shape_cast %51 : vector<9x128xf32> to vector<1x9x128xf32>
    %53 = vector.shape_cast %9 : vector<1x128xf32> to vector<1x1x128xf32>
    %54 = vector.broadcast %53 : vector<1x1x128xf32> to vector<1x9x128xf32>
    %55 = arith.addf %52, %54 : vector<1x9x128xf32>
    %56 = vector.extract_strided_slice %55 {offsets = [0, 0, 0], sizes = [1, 8, 128], strides = [1, 1, 1]} : vector<1x9x128xf32> to vector<1x8x128xf32>
    %57 = arith.addf %56, %13 : vector<1x8x128xf32>
    %c0_19 = arith.constant 0 : index
    %c0_20 = arith.constant 0 : index
    %c0_21 = arith.constant 0 : index
    %58 = vector.load %arg5[%c0_19, %c0_20, %c0_21] : memref<1x8x128xf32, #tpu.memory_space<vmem>>, vector<1x8x128xf32>
    tpu.vector_store %arg5[%c0_19, %c0_20, %c0_21], %57 {strides = array<i32>} : memref<1x8x128xf32, #tpu.memory_space<vmem>>, vector<1x8x128xf32>,
    %59 = vector.extract_strided_slice %55 {offsets = [0, 8, 0], sizes = [1, 1, 128], strides = [1, 1, 1]} : vector<1x9x128xf32> to vector<1x1x128xf32>
    %cst_22 = arith.constant dense<0.000000e+00> : vector<1x128xf32>
    %60 = vector.multi_reduction <add>, %13, %cst_22 [1] : vector<1x8x128xf32> to vector<1x128xf32>
    %61 = vector.shape_cast %60 : vector<1x128xf32> to vector<1x1x128xf32>
    %cst_23 = arith.constant 8.000000e+00 : f32
    %62 = vector.broadcast %cst_23 : f32 to vector<1x1x128xf32>
    %63 = arith.divf %61, %62 : vector<1x1x128xf32>
    %64 = arith.addf %59, %63 : vector<1x1x128xf32>
    %c0_24 = arith.constant 0 : index
    %c0_25 = arith.constant 0 : index
    %c0_26 = arith.constant 0 : index
    %65 = vector.load %arg6[%c0_24, %c0_25, %c0_26] : memref<1x1x128xf32, #tpu.memory_space<vmem>>, vector<1x1x128xf32>
    tpu.vector_store %arg6[%c0_24, %c0_25, %c0_26], %64 {strides = array<i32>} : memref<1x1x128xf32, #tpu.memory_space<vmem>>, vector<1x1x128xf32>,
    return
  }
  func.func @transform_0(%arg0: i32) -> (i32, i32, i32) {
    %c0_i32 = arith.constant 0 : i32
    %c0_i32_0 = arith.constant 0 : i32
    %c0_i32_1 = arith.constant 0 : i32
    return %arg0, %c0_i32, %c0_i32_0 : i32, i32, i32
  }
  func.func @transform_1(%arg0: i32) -> (i32, i32) {
    %c0_i32 = arith.constant 0 : i32
    %c0_i32_0 = arith.constant 0 : i32
    %c0_i32_1 = arith.constant 0 : i32
    return %c0_i32, %c0_i32_0 : i32, i32
  }
  func.func @transform_2(%arg0: i32) -> (i32, i32) {
    %c0_i32 = arith.constant 0 : i32
    %c0_i32_0 = arith.constant 0 : i32
    %c0_i32_1 = arith.constant 0 : i32
    return %c0_i32, %c0_i32_0 : i32, i32
  }
  func.func @transform_3(%arg0: i32) -> (i32, i32) {
    %c0_i32 = arith.constant 0 : i32
    %c0_i32_0 = arith.constant 0 : i32
    %c0_i32_1 = arith.constant 0 : i32
    return %c0_i32, %c0_i32_0 : i32, i32
  }
  func.func @transform_4(%arg0: i32) -> (i32, i32, i32) {
    %c0_i32 = arith.constant 0 : i32
    %c0_i32_0 = arith.constant 0 : i32
    %c0_i32_1 = arith.constant 0 : i32
    return %arg0, %c0_i32, %c0_i32_0 : i32, i32, i32
  }
  func.func @transform_5(%arg0: i32) -> (i32, i32, i32) {
    %c0_i32 = arith.constant 0 : i32
    %c0_i32_0 = arith.constant 0 : i32
    %c0_i32_1 = arith.constant 0 : i32
    return %arg0, %c0_i32, %c0_i32_0 : i32, i32, i32
  }
}

</mosaic_0001>

<bundles_post_ra>
// kernel: _textcnn_pallas.1
= control target key start
LH: loop header
LB: loop body
LE: loop exit
PB: predicated region body
PF: predicated region fallthrough
CT: control target
= control target key end

     0   :  { %11 = vsyncpa [#allocation3], 0  ;;  %s1771_s0 = inlined_call_operand.vmem [shape: bf16[2,16,32], index: 0, kind: input, shape index: {}]   ;;  %s1772_s1 = inlined_call_operand.hbm [shape: bf16[32,896], index: 1, kind: input, shape index: {}]   ;;  %s1773_s2 = inlined_call_operand.hbm [shape: bf16[384,128], index: 2, kind: input, shape index: {}]   ;;  %s1774_s3 = inlined_call_operand.vmem [shape: f32[8,128], index: 3, kind: input, shape index: {}]   ;;  %s1775_s4 = inlined_call_operand.hbm [shape: f32[2,8,128], index: 4, kind: output, shape index: {0}]   ;;  %s1776_s5 = inlined_call_operand.hbm [shape: f32[2,1,128], index: 5, kind: output, shape index: {1}]  }
   0x1   :  { %12 = vsyncpa [#allocation6], 0 }
   0x2   :  { %13 = vsyncpa [#allocation4], 0 }
   0x3   :  { %15 = vsyncpa [#allocation4 + $0x1], 0 }
   0x4   :  { %16 = vsyncpa [#allocation9], 0 }
   0x5   :  { %18 = vsyncpa [#allocation9 + $0x1], 0  ;;  %s1514_s18 = smov 0   ;;  %s1516_s19 = smov 0  }
   0x6   :  { %s1518_s20 = smov 0   ;;  %s1520_s21 = smov 0  }
   0x7 LB: > { %s1535_s22 = sadd.s32 4294967295, %s1471_s21   ;;  %s1069_s23 = sadd.s32 4294967294, %s1471_s21   ;;  %s1471_s21 = sphi %s1520_s21, %s1794_s21   ;;  %s1467_s20 = sphi %s1518_s20, %s1793_s20   ;;  %s1463_s19 = sphi %s1516_s19, %s1792_s19   ;;  %s1459_s18 = sphi %s1514_s18, %s1791_s18  }
   0x8   : > { %s1539_s24 = sadd.s32 1, %s1471_s21   ;;  %s120_s25 = sadd.s32 1, %s1467_s20 }
   0x9   : > { %s117_s26 = ssub.s32 %s1471_s21, %s1539_s24  ;;  %p130_p0 = scmp.ne.s32.totalorder %s1467_s20, %s1463_s19 }
   0xa   : > { %p118_p1 = scmp.eq.s32.totalorder %s117_s26, 0  ;;  %p131_p2 = scmp.eq.s32.totalorder %s1535_s22, 1 }
   0xb   : > { %p136_p3 = scmp.ne.s32.totalorder %s1463_s19, %s1459_s18  ;;  %p137_p4 = scmp.eq.s32.totalorder %s1069_s23, 1 }
   0xc   : > { %s1550_s27 = scalar_select %p118_p1, %s1467_s20, %s120_s25  }
   0xd   : > { %p1552_p5 = por %p131_p2, %p130_p0  ;;  %p1556_p6 = por %p137_p4, %p136_p3 }
   0xe   : > { %p1070_p7 = scmp.ge.s32.totalorder %s1471_s21, 1  ;;  %p170_p8 = scmp.lt.s32.totalorder %s1471_s21, 3 }
   0xf   : > { %s1780_s28 = scalar_select %p1552_p5, 1, 0 }
  0x10   : > { %s1781_s29 = scalar_select %p1556_p6, 1, 0 }
  0x11   : > { %p1777_p9 = scmp.eq.s32.totalorder %s1535_s22, 0  ;;  %p1563_p10 = pnand %p1070_p7, %p170_p8 }
  0x12   : > { %s1473_s6 = smov [#allocation2]   ;;  %s1474_s9 = smov [#allocation5]  }
  0x13   : > { %s1782_s30 = scalar_select %p1563_p10, 1, 0 }
  0x14   : > { %s182_s7 = sshll.u32 %s1473_s6, 4  ;;  %p1208_p11 = pneg %p1563_p10  ;;  %s183_s7 = int_to_ptr.vmem [resolvable:$true] %s182_s7 }
  0x15   : > { %s195_s10 = sshll.u32 %s1474_s9, 4  ;;  %s1313_s13 = scalar_lea.hbm %s1772_s1, 1792  ;;  %s1575_s10 = int_to_ptr.vmem [resolvable:$true] %s195_s10 }
  0x16   : > { %p1571_p12 = pnand %p1777_p9, %p1208_p11  ;;  %p1314_p13 = scmp.ne.s32.totalorder %s1772_s1, %s1313_s13 }
  0x17   : > { %p1320_p3 = scmp.lt.u32.totalorder %s1313_s13, %s1772_s1 }
  0x18   : > { %p1315_p0 = pneg %p1571_p12 }
  0x1a   : > { %p1316_p1 = pnand %p1315_p0, %p1314_p13 }
  0x1c   : > { %p1317_p2 = pneg %p1316_p1 }
  0x1e   : > { %p1322_p4 = pnand %p1320_p3, %p1317_p2 }
  0x20   : > { %1325 = shalt.err (!%p1322_p4)
}
  0x21   : > { %s1326_s23 = scalar_lea.vmem %s183_s7, 1792  ;;  %p1334_p9 = scmp.lt.s32.totalorder %s183_s7, %s183_s7 }
  0x22   : > { %p1327_p7 = scmp.ne.s32.totalorder %s183_s7, %s1326_s23  ;;  %p1335_p6 = scmp.lt.s32.totalorder %s1326_s23, %s1326_s23 }
  0x24   : > { %p1329_p8 = pnand %p1327_p7, %p1315_p0  ;;  %p1336_p5 = por %p1335_p6, %p1334_p9 }
  0x26   : > { %p1330_p11 = pneg %p1329_p8 }
  0x28   : > { %p1337_p10 = pnand %p1336_p5, %p1330_p11 }
  0x2a   : > { %1340 = shalt.err (!%p1337_p10)
}
  0x2b   : > { %s1475_s25 = smov 448   ;;  %s1476_s26 = smov 28  }
  0x2c   : > { %1211 = dma.hbm_to_vmem [thread:$0]  (!%p1571_p12), %s1772_s1, 1792, %s183_s7, [#allocation3], %s1475_s25, %s1475_s25, %s1476_s26  }
  0x2d   : > { %s1341_s13 = scalar_lea.hbm %s1773_s2, 3072 }
  0x2e   : > { %p1342_p13 = scmp.ne.s32.totalorder %s1773_s2, %s1341_s13  ;;  %p1348_p9 = scmp.lt.u32.totalorder %s1341_s13, %s1773_s2 }
  0x30   : > { %p1344_p5 = pnand %p1342_p13, %p1315_p0 }
  0x32   : > { %p1345_p6 = pneg %p1344_p5 }
  0x34   : > { %p1350_p10 = pnand %p1348_p9, %p1345_p6 }
  0x36   : > { %1353 = shalt.err (!%p1350_p10)
}
  0x37   : > { %s1354_s7 = scalar_lea.vmem %s1575_s10, 3072  ;;  %p1362_p4 = scmp.lt.s32.totalorder %s1575_s10, %s1575_s10 }
  0x38   : > { %p1355_p1 = scmp.ne.s32.totalorder %s1575_s10, %s1354_s7  ;;  %p1363_p7 = scmp.lt.s32.totalorder %s1354_s7, %s1354_s7 }
  0x3a   : > { %p1357_p2 = pnand %p1355_p1, %p1315_p0  ;;  %p1364_p8 = por %p1363_p7, %p1362_p4 }
  0x3c   : > { %p1358_p3 = pneg %p1357_p2 }
  0x3e   : > { %p1365_p11 = pnand %p1364_p8, %p1358_p3 }
  0x40   : > { %1368 = shalt.err (!%p1365_p11)
}
  0x41   : > { %s1477_s23 = smov 64   ;;  %s1478_s25 = smov 4  }
  0x42   : > { %1214 = dma.hbm_to_vmem [thread:$0]  (!%p1571_p12), %s1773_s2, 3072, %s1575_s10, [#allocation6], %s1477_s23, %s1477_s23, %s1478_s25  }
  0x43   : > { %p1784_p13 = scmp.ne.s32.totalorder %s1782_s30, 0 }
  0x44   : > { %p1785_p0 = scmp.eq.s32.totalorder (!%p1784_p13), %s1535_s22, 0 }
  0x45   : > { %222 = sbr.rel (%p1784_p13) target bundleno = 593 (0x251), region = 36 }
  0x4c   : > { %1442 = dma.done.wait (%p1785_p0), [#allocation3], 1792   ;;  %p1786_p5 = pmov %p1785_p0 }
  0x4d   : > { %p1787_p6 = pmov %p1785_p0 }
  0x4e   : > { %1444 = vsyncadd (%p1786_p5), [#allocation3], 4294965504 }
  0x4f   : > { %1446 = dma.done.wait (%p1787_p6), [#allocation6], 3072   ;;  %p1788_p9 = pmov %p1785_p0 }
  0x50   : > { %p258_p10 = scmp.lt.s32.totalorder %s1535_s22, 1  ;;  %v1479_v0 = vmov 0   ;;  %v1268_v1 = vld [vmem:[#allocation2 + $0x4] ss:$28 sps:$4 sm:$0xff]   ;;  %v1270_v2 = vld [vmem:[#allocation2 + $0xc] ss:$28 sps:$4 sm:$0xff]  }
  0x51   : > { %1448 = vsyncadd (%p1788_p9), [#allocation6], 4294964224  ;;  %395 = vmatprep.mubr.bf16.mxu0 %v1479_v0  ;;  %438 = vmatprep.mubr.bf16.mxu1 %v1479_v0  ;;  %v1272_v3 = vld [vmem:[#allocation2] ss:$28 sps:$4 sm:$0xff]   ;;  %v1273_v4 = vld [vmem:[#allocation2 + $0x8] ss:$28 sps:$4 sm:$0xff]  }
  0x52   : > { %s259_s30 = scalar_select %p258_p10, %s1535_s22, 1  ;;  %363 = vmatprep.subr.bf16.mxu0 %v1268_v1  ;;  %406 = vmatprep.subr.bf16.mxu1 %v1270_v2  ;;  %v1274_v5 = vld [vmem:[#allocation2 + $0x3c] ss:$28 sps:$4 sm:$0xff]   ;;  %v1276_v6 = vld [vmem:[#allocation2 + $0x44] ss:$28 sps:$4 sm:$0xff]   ;;  %vm359_vm0 = vcmask 261120  }
  0x53   : > { %364 = vmatpush1.bf16.msra.mxu0 %v1272_v3  ;;  %407 = vmatpush1.bf16.msra.mxu1 %v1273_v4  ;;  %v1278_v7 = vld [vmem:[#allocation2 + $0x38] ss:$28 sps:$4 sm:$0xff]   ;;  %v1279_v8 = vld [vmem:[#allocation2 + $0x40] ss:$28 sps:$4 sm:$0xff]   ;;  %v1281_v10 = vld [vmem:[#allocation2 + $0x10] ss:$28 sps:$4 sm:$0xff]  }
  0x54   : > { %s1133_s8 = sshll.u32 %s259_s30, 3  ;;  %365 = vmatprep.subr.bf16.mxu0 %v1274_v5  ;;  %408 = vmatprep.subr.bf16.mxu1 %v1276_v6  ;;  %v1283_v11 = vld [vmem:[#allocation2 + $0x14] ss:$28 sps:$4 sm:$0xff]   ;;  %v1480_v13 = vmov 0.0   ;;  %v1287_v14 = vld [vmem:[#allocation2 + $0x4c] ss:$28 sps:$4 sm:$0xff]  }
  0x55   : > { %s262_s11 = scalar_lea.vmem %s1771_s0, %s1133_s8  ;;  %v1284_v12 = vld [vmem:[#allocation2 + $0x18] ss:$28 sps:$4 sm:$0xff]   ;;  %v1285_v15 = vld [vmem:[#allocation2 + $0x48] ss:$28 sps:$4 sm:$0xff]   ;;  %v1288_v16 = vld [vmem:[#allocation2 + $0x50] ss:$28 sps:$4 sm:$0xff]  }
  0x56   : > { %v1280_v9 = vld [vmem:[%s262_s11] sm:$0xff]   ;;  %v1289_v17 = vld [vmem:[#allocation5 + $0x40] sm:$0xff]   ;;  %vm1481_vm1 = vmmov 0   ;;  %v1291_v19 = vld [vmem:[#allocation5 + $0x48] sm:$0xff]   ;;  %vm553_vm2 = vcmask 1046528   ;;  %vm590_vm3 = vcmask 1047553  }
  0x57   : > { %366 = vmatpush1.bf16.msra.mxu0 %v1278_v7  ;;  %409 = vmatpush1.bf16.msra.mxu1 %v1279_v8  ;;  %v1290_v18 = vld [vmem:[#allocation5] sm:$0xff]   ;;  %v1292_v20 = vld [vmem:[#allocation5 + $0x8] sm:$0xff]   ;;  %v1294_v22 = vld [vmem:[#allocation5 + $0x50] sm:$0xff]   ;;  %vm592_vm4 = vcmask 1040384   ;;  %vm578_vm5 = vcmask 1045504   ;;  %s1682_s25 = sand.u32 1, %s1463_s19  }
  0x58   : > { %449 = vmatprep.subr.bf16.mxu0 %v1283_v11  ;;  %1168 = vmatprep.subr.bf16.mxu1 %v1480_v13  ;;  %v1293_v21 = vld [vmem:[#allocation5 + $0x80] sm:$0xff]   ;;  %v1295_v23 = vld [vmem:[#allocation5 + $0x10] sm:$0xff]   ;;  %v1296_v24 = vld [vmem:[#allocation5 + $0x88] sm:$0xff]   ;;  %s1077_s26 = sshll.u32 %s1682_s25, 3  ;;  %s1129_s8 = sshll.u32 %s1535_s22, 7 }
  0x59   : > { %v1297_v25 = vld [vmem:[#allocation5 + $0x58] sm:$0xff]   ;;  %v1299_v27 = vld [vmem:[#allocation5 + $0x90] sm:$0xff]   ;;  %v1300_v28 = vld [vmem:[#allocation5 + $0x60] sm:$0xff]   ;;  %s251_s10 = scalar_lea.vmem [#allocation7], %s1077_s26  ;;  %s1130_s11 = sshll.u32 %s1535_s22, 4 }
  0x5a   : > { %1095 = vmatmul.mubr.msk.bf16.vlgmr.msra.gmra.mrb[0].mxu0 %vm359_vm0, %v1280_v9  ;;  %1096 = vmatmul.mubr.msk.bf16.vlgmr.msra.gmra.mrb[0].mxu1 %vm359_vm0, %v1280_v9  ;;  %v1298_v26 = vld [vmem:[#allocation5 + $0x18] sm:$0xff]   ;;  %v1301_v29 = vld [vmem:[#allocation5 + $0x20] sm:$0xff]   ;;  %v1303_v31 = vld [vmem:[#allocation5 + $0x68] sm:$0xff]   ;;  %s947_s9 = sshll.u32 %s251_s10, 4  ;;  %s257_s12 = scalar_lea.vmem [#allocation8], %s1682_s25  ;;  %s1699_s9 = int_to_ptr.vmem [resolvable:$true] %s947_s9 }
  0x5b   : > { %450 = vmatpush1.bf16.msra.mxu0 %v1281_v10  ;;  %1169 = vmatpush3.bf16.msra.mxu1 %v1284_v12  ;;  %v1302_v30 = vld [vmem:[#allocation5 + $0x98] sm:$0xff]   ;;  %v1304_v32 = vld [vmem:[#allocation5 + $0x28] sm:$0xff]   ;;  %v1305_v33 = vld [vmem:[#allocation5 + $0xa0] sm:$0xff]   ;;  %s960_s13 = sshll.u32 %s257_s12, 4  ;;  %s1697_s16 = scalar_lea.hbm %s1775_s4, %s1129_s8  ;;  %s1706_s13 = int_to_ptr.vmem [resolvable:$true] %s960_s13 }
  0x5c   : > { %451 = vmatprep.subr.bf16.mxu0 %v1287_v14  ;;  %1170 = vmatprep.subr.bf16.mxu1 %v1480_v13  ;;  %v1306_v34 = vld [vmem:[#allocation5 + $0x70] sm:$0xff]   ;;  %v1308_v36 = vld [vmem:[#allocation5 + $0xa8] sm:$0xff]   ;;  %v1309_v37 = vld [vmem:[#allocation5 + $0x78] sm:$0xff]   ;;  %s1704_s7 = scalar_lea.hbm %s1776_s5, %s1130_s11  ;;  %s930_s23 = scalar_lea.sflag [#allocation4], %s1682_s25 }
  0x5d   : > { %481 = vmatprep.mubr.bf16.mxu0 %v1479_v0  ;;  %1172 = vmatprep.mubr.msk.bf16.mxu1 %vm1481_vm1, %v1480_v13  ;;  %v1307_v35 = vld [vmem:[#allocation5 + $0x30] sm:$0xff]   ;;  %v1310_v38 = vld [vmem:[#allocation5 + $0x38] sm:$0xff]   ;;  %s1369_s26 = scalar_lea.vmem %s1699_s9, 128  ;;  %p1789_p1 = scmp.ne.s32.totalorder %s1780_s28, 0 }
  0x5e   : > { %v1311_v39 = vld [vmem:[#allocation5 + $0xb0] sm:$0xff]   ;;  %v1312_v40 = vld [vmem:[#allocation5 + $0xb8] sm:$0xff]   ;;  %p1370_p12 = scmp.ne.s32.totalorder %s1699_s9, %s1369_s26  ;;  %s1482_s6 = smov [#allocation7]  }
  0x5f   : > { %452 = vmatpush1.bf16.msra.mxu0 %v1285_v15  ;;  %1171 = vmatpush3.bf16.msra.mxu1 %v1288_v16  ;;  %v1099_v41 = vld [vmem:[%s1774_s3] ss:$0 sm:$0xff]  ;;  %v1100_v42 = vld [vmem:[%s1774_s3 + $0x1] ss:$0 sm:$0xff]  ;;  %v1101_v61 = vld [vmem:[%s1774_s3 + $0x2] ss:$0 sm:$0xff] }
  0x60   : > { %1137 = vmatprep.subr.bf16.mxu0 %v1289_v17  ;;  %1176 = vmatprep.subr.bf16.mxu1 %v1480_v13  ;;  %p1371_p2 = pnand %p1370_p12, %p1789_p1  ;;  %s1373_s30 = sshll.u32 %s1482_s6, 4  ;;  %s1374_s30 = int_to_ptr.vmem [resolvable:$false] %s1373_s30 }
  0x61   : > { %s1375_s8 = scalar_lea.vmem %s1374_s30, 256  ;;  %p1376_p4 = scmp.lt.s32.totalorder %s1699_s9, %s1374_s30 }
  0x62   : > { %1097 = vmatmul.mubr.msk.bf16.vlgmr.msra.gmra.mrb[4].mxu0 %vm359_vm0, %v1280_v9  ;;  %1173 = vmatmul.mubr.msk.bf16.vlgmr.msra.gmra.mrb[4].mxu1 %vm359_vm0, %v1280_v9  ;;  %p1372_p3 = pneg %p1371_p2  ;;  %p1377_p7 = scmp.lt.s32.totalorder %s1375_s8, %s1369_s26 }
  0x63   : > { %1192 = vmatprep.mubr.msk.bf16.mxu1 %vm1481_vm1, %v1480_v13  ;;  %1138 = vmatpush3.bf16.msra.mxu0 %v1290_v18 }
  0x64   : > { %1139 = vmatprep.subr.bf16.mxu0 %v1291_v19  ;;  %1177 = vmatpush3.bf16.msra.mxu1 %v1293_v21  ;;  %p1378_p8 = por %p1377_p7, %p1376_p4 }
  0x65   : > { %1178 = vmatprep.subr.bf16.mxu1 %v1480_v13 }
  0x66   : > { %p1379_p11 = pnand %p1378_p8, %p1372_p3 }
  0x67   : > { %1140 = vmatpush3.bf16.msra.mxu0 %v1292_v20 }
  0x68   : > { %1141 = vmatprep.subr.bf16.mxu0 %v1294_v22  ;;  %1179 = vmatpush3.bf16.msra.mxu1 %v1296_v24 }
  0x69   : > { %1180 = vmatprep.subr.bf16.mxu1 %v1480_v13 }
  0x6b   : > { %1142 = vmatpush3.bf16.msra.mxu0 %v1295_v23 }
  0x6c   : > { %1143 = vmatprep.subr.bf16.mxu0 %v1297_v25  ;;  %1181 = vmatpush3.bf16.msra.mxu1 %v1299_v27 }
  0x6d   : > { %1182 = vmatprep.subr.bf16.mxu1 %v1480_v13 }
  0x6f   : > { %1144 = vmatpush3.bf16.msra.mxu0 %v1298_v26 }
  0x70   : > { %1145 = vmatprep.subr.bf16.mxu0 %v1300_v28  ;;  %1183 = vmatpush3.bf16.msra.mxu1 %v1302_v30 }
  0x71   : > { %1184 = vmatprep.subr.bf16.mxu1 %v1480_v13 }
  0x73   : > { %1146 = vmatpush3.bf16.msra.mxu0 %v1301_v29 }
  0x74   : > { %1147 = vmatprep.subr.bf16.mxu0 %v1303_v31  ;;  %1185 = vmatpush3.bf16.msra.mxu1 %v1305_v33 }
  0x75   : > { %1186 = vmatprep.subr.bf16.mxu1 %v1480_v13 }
  0x77   : > { %1148 = vmatpush3.bf16.msra.mxu0 %v1304_v32 }
  0x78   : > { %1149 = vmatprep.subr.bf16.mxu0 %v1306_v34  ;;  %1187 = vmatpush3.bf16.msra.mxu1 %v1308_v36  ;;  %v1102_v36 = vld [vmem:[%s1774_s3 + $0x3] ss:$0 sm:$0xff] }
  0x79   : > { %1188 = vmatprep.subr.bf16.mxu1 %v1480_v13 }
  0x7b   : > { %1150 = vmatpush3.bf16.msra.mxu0 %v1307_v35 }
  0x7c   : > { %1151 = vmatprep.subr.bf16.mxu0 %v1309_v37  ;;  %1189 = vmatpush3.bf16.msra.mxu1 %v1311_v39 }
  0x7d   : > { %1190 = vmatprep.subr.bf16.mxu1 %v1480_v13 }
  0x7f   : > { %1152 = vmatpush3.bf16.msra.mxu0 %v1310_v38 }
  0x80   : > { %1191 = vmatpush3.bf16.msra.mxu1 %v1312_v40 }
 0x12d   : > { %v397_v43 = vpop.f32.mrb[0].mxu0  ;;  %v440_v44 = vpop.f32.mrb[0].mxu1 }
 0x12e   : > { %v541_v45 = vadd.f32 %v1099_v41, %v397_v43  ;;  %v399_v46 = vpop.f32.mrb[1].mxu0  ;;  %v442_v47 = vpop.f32.mrb[1].mxu1 }
 0x12f   : > { %v547_v48 = vadd.f32 %v1100_v42, %v399_v46  ;;  %v554_v49 = vrot.slane %v442_v47, 1  ;;  %v401_v50 = vpop.f32.mrb[2].mxu0  ;;  %v444_v51 = vpop.f32.mrb[2].mxu1 }
 0x130   : > { %v542_v52 = vadd.f32 %v1099_v41, %v401_v50  ;;  %v403_v53 = vpop.f32.mrb[3].mxu0  ;;  %v446_v54 = vpop.f32.mrb[3].mxu1  ;;  %v913_v58 = vrot.slane %v541_v45, 1 }
 0x131   : > { %v549_v55 = vmax.f32 %v547_v48, 0.0  ;;  %v548_v56 = vadd.f32 %v1100_v42, %v403_v53  ;;  %v555_v57 = vrot.slane %v446_v54, 1 }
 0x132   : > { %v914_v59 = vrot.slane %v542_v52, 1 }
 0x133   : > { %v550_v60 = vmax.f32 %v548_v56, 0.0  ;;  %v556_v62 = vsel %vm553_vm2, %v554_v49, %v555_v57  ;;  %v560_v1 = vadd.f32 %v555_v57, %v444_v51  ;;  %v591_v2 = vsel %vm590_vm3, %v549_v55, -inf }
 0x134   : > { %v1666_v63 = vsel %vm553_vm2, %v913_v58, %v914_v59  ;;  %v559_v0 = vadd.f32 %v556_v62, %v440_v44  ;;  %v618_v3 = vrot.slane %v549_v55, 1 }
 0x135   : > { %v593_v4 = vsel %vm592_vm4, %v550_v60, -inf  ;;  %v619_v5 = vrot.slane %v550_v60, 1  ;;  %v483_v6 = vpop.f32.mrb[4].mxu0  ;;  %v525_v7 = vpop.f32.mrb[4].mxu1  ;;  %v566_v10 = vadd.f32 %v1101_v61, %v560_v1  ;;  %v919_v58 = vrot.slane %v1666_v63, 4 }
 0x136   : > { %v594_v8 = vmax.f32 %v591_v2, %v593_v4  ;;  %v565_v9 = vadd.f32 %v1101_v61, %v559_v0  ;;  %v485_v11 = vpop.f32.mrb[5].mxu0  ;;  %v1174_v12 = vpop.f32.mrb[5].mxu1  ;;  %v579_v14 = vrot.slane %v525_v7, 2 }
 0x137   : > { %v620_v13 = vsel %vm553_vm2, %v618_v3, %v619_v5  ;;  %v487_v15 = vpop.f32.mrb[6].mxu0  ;;  %v528_v16 = vpop.f32.mrb[6].mxu1  ;;  %v568_v19 = vmax.f32 %v566_v10, 0.0  ;;  %v571_v23 = vrot.slane %v485_v11, 1  ;;  %v920_v59 = vadd.f32 %v919_v58, %v1666_v63 }
 0x138   : > { %v595_v17 = vrot.slane %v594_v8, 4  ;;  %v567_v18 = vmax.f32 %v565_v9, 0.0  ;;  %v488_v20 = vpop.f32.mrb[7].mxu0  ;;  %v580_v21 = vrot.slane %v528_v16, 2  ;;  %v1175_v22 = vpop.f32.mrb[7].mxu1 }
 0x139   : > { %v572_v24 = vrot.slane %v488_v20, 1  ;;  %v602_v27 = vsel %vm592_vm4, %v568_v19, -inf  ;;  %v625_v30 = vrot.slane %v568_v19, 1  ;;  %v921_v60 = vrot.slane %v920_v59, 2 }
 0x13a   : > { %v596_v25 = vmax.f32 %v594_v8, %v595_v17  ;;  %v601_v26 = vsel %vm590_vm3, %v567_v18, -inf  ;;  %v624_v28 = vrot.slane %v567_v18, 1  ;;  %v581_v32 = vsel %vm578_vm5, %v579_v14, %v580_v21 }
 0x13b   : > { %v603_v29 = vmax.f32 %v601_v26, %v602_v27  ;;  %v573_v31 = vsel %vm553_vm2, %v571_v23, %v572_v24  ;;  %v922_v61 = vadd.f32 %v921_v60, %v920_v59 }
 0x13c   : > { %v597_v33 = vrot.slane %v596_v25, 2  ;;  %v575_v34 = vadd.f32 %v573_v31, %v483_v6  ;;  %v626_v37 = vsel %vm553_vm2, %v624_v28, %v625_v30  ;;  %v1127_v6 = vld [vmem:[%s1774_s3 + $0x4] ss:$0 sm:$0xff] }
 0x13d   : > { %v604_v35 = vrot.slane %v603_v29, 4  ;;  %v923_v4 = vrot.slane %v922_v61, 1 }
 0x13e   : > { %v598_v38 = vmax.f32 %v596_v25, %v597_v33  ;;  %v583_v39 = vadd.f32 %v581_v32, %v575_v34 }
 0x13f   : > { %v605_v40 = vmax.f32 %v603_v29, %v604_v35  ;;  %v924_v10 = vadd.f32 %v923_v4, %v922_v61 }
 0x140   : > { %v599_v41 = vrot.slane %v598_v38, 1  ;;  %v588_v42 = vadd.f32 %v1102_v36, %v583_v39 }
 0x141   : > { %v606_v43 = vrot.slane %v605_v40, 2  ;;  %v926_v17 = vmul.f32 0.125, %v924_v10 }
 0x142   : > { %v589_v44 = vmax.f32 %v588_v42, 0.0  ;;  %v600_v45 = vmax.f32 %v598_v38, %v599_v41 }
 0x143   : > { %v607_v46 = vmax.f32 %v605_v40, %v606_v43 }
 0x144   : > { %v610_v47 = vrot.slane %v589_v44, 4  ;;  %v628_v48 = vpack.c.bf16 %v600_v45, %v620_v13 }
 0x145   : > { %v608_v49 = vrot.slane %v607_v46, 1 }
 0x146   : > { %v611_v50 = vmax.f32 %v589_v44, %v610_v47 }
 0x147   : > { %v609_v51 = vmax.f32 %v607_v46, %v608_v49 }
 0x148   : > { %v612_v52 = vrot.slane %v611_v50, 2 }
 0x149   : > { %v629_v53 = vpack.c.bf16 %v609_v51, %v626_v37 }
 0x14a   : > { %v613_v54 = vmax.f32 %v611_v50, %v612_v52 }
 0x14b   : > { %855 = vmatprep.mubr.bf16.mxu0 %v629_v53 }
 0x14c   : > { %856 = vmatmul.mubr.bf16.vlgmr.msra.gmra.mrb[8].mxu0 %v628_v48  ;;  %v614_v55 = vrot.slane %v613_v54, 1 }
 0x14e   : > { %v615_v56 = vmax.f32 %v613_v54, %v614_v55 }
 0x150   : > { %v630_v57 = vpack.c.bf16 %v615_v56, %v589_v44 }
 0x152   : > { %1193 = vmatmul.mubr.bf16.vlgmr.msra.gmra.mrb[8].mxu1 %v630_v57 }
 0x21f   : > { %v1153_v62 = vpop.f32.mrb[8].mxu0 }
 0x220   : > { %v1154_v0 = vpop.f32.mrb[9].mxu0 }
 0x221   : > { %v1155_v1 = vadd.f32 %v1154_v0, %v1153_v62  ;;  %v1156_v2 = vpop.f32.mrb[10].mxu0 }
 0x222   : > { %v1157_v3 = vpop.f32.mrb[11].mxu0 }
 0x223   : > { %v1158_v5 = vadd.f32 %v1157_v3, %v1156_v2 }
 0x225   : > { %v898_v7 = vpop.f32.mrb[8].mxu1 }
 0x226   : > { %v899_v8 = vadd.f32 %v1155_v1, %v898_v7  ;;  %v1194_v9 = vpop.f32.mrb[9].mxu1 }
 0x227   : > { %v901_v11 = vpop.f32.mrb[10].mxu1 }
 0x228   : > { %v909_v12 = vadd.f32 %v1127_v6, %v899_v8  ;;  %v902_v13 = vadd.f32 %v1158_v5, %v901_v11  ;;  %v1195_v14 = vpop.f32.mrb[11].mxu1 }
 0x22a   : > { %v917_v15 = vadd.f32 %v1666_v63, %v909_v12  ;;  %v910_v16 = vadd.f32 %v1127_v6, %v902_v13 }
 0x22c   : > { %v927_v18 = vadd.f32 %v926_v17, %v910_v16  ;;  %918 = vst [vmem:[%s251_s10] sm:$0xff] %v917_v15 }
 0x22d   : > { %1382 = shalt.err (!%p1379_p11)
}
 0x22e   : > { %s1383_s10 = scalar_lea.hbm %s1697_s16, 128  ;;  %s1387_s15 = scalar_lea.hbm %s1775_s4, 256 }
 0x22f   : > { %p1384_p13 = scmp.ne.s32.totalorder %s1697_s16, %s1383_s10  ;;  %p1388_p6 = scmp.lt.u32.totalorder %s1697_s16, %s1775_s4 }
 0x230   : > { %p1389_p9 = scmp.lt.u32.totalorder %s1387_s15, %s1383_s10  ;;  %p1391_p12 = scmp.lt.u32.totalorder %s1383_s10, %s1697_s16 }
 0x231   : > { %p1385_p0 = pnand %p1384_p13, %p1789_p1 }
 0x232   : > { %p1390_p10 = por %p1389_p9, %p1388_p6 }
 0x233   : > { %p1386_p5 = pneg %p1385_p0 }
 0x234   : > { %p1392_p2 = por %p1391_p12, %p1390_p10 }
 0x236   : > { %p1393_p3 = pnand %p1392_p2, %p1386_p5 }
 0x238   : > { %1396 = shalt.err (!%p1393_p3)
}
 0x239   : > { %1204 = dma.vmem_to_hbm [thread:$0]  (%p1789_p1), %s1699_s9, 128, %s1697_s16, %s930_s23   ;;  %928 = vst [vmem:[%s257_s12] sm:$0x1] %v927_v18 }
 0x23a   : > { %s935_s26 = scalar_lea.sflag [#allocation9], %s1682_s25  ;;  %s1397_s6 = scalar_lea.vmem %s1706_s13, 16 }
 0x23b   : > { %p1398_p4 = scmp.ne.s32.totalorder %s1706_s13, %s1397_s6  ;;  %s1483_s30 = smov [#allocation8]  }
 0x23c   : > { %s1401_s8 = sshll.u32 %s1483_s30, 4  ;;  %s1402_s8 = int_to_ptr.vmem [resolvable:$false] %s1401_s8 }
 0x23d   : > { %p1399_p7 = pnand %p1398_p4, %p1789_p1  ;;  %s1403_s10 = scalar_lea.vmem %s1402_s8, 32 }
 0x23e   : > { %p1404_p11 = scmp.lt.s32.totalorder %s1706_s13, %s1402_s8  ;;  %p1405_p13 = scmp.lt.s32.totalorder %s1403_s10, %s1397_s6 }
 0x23f   : > { %p1400_p8 = pneg %p1399_p7 }
 0x240   : > { %p1406_p0 = por %p1405_p13, %p1404_p11 }
 0x242   : > { %p1407_p5 = pnand %p1406_p0, %p1400_p8 }
 0x244   : > { %1410 = shalt.err (!%p1407_p5)
}
 0x245   : > { %s1411_s25 = scalar_lea.hbm %s1704_s7, 16  ;;  %s1415_s16 = scalar_lea.hbm %s1776_s5, 32 }
 0x246   : > { %p1412_p6 = scmp.ne.s32.totalorder %s1704_s7, %s1411_s25  ;;  %p1416_p12 = scmp.lt.u32.totalorder %s1704_s7, %s1776_s5 }
 0x247   : > { %p1417_p2 = scmp.lt.u32.totalorder %s1415_s16, %s1411_s25  ;;  %p1419_p4 = scmp.lt.u32.totalorder %s1411_s25, %s1704_s7 }
 0x248   : > { %p1413_p9 = pnand %p1412_p6, %p1789_p1 }
 0x249   : > { %p1418_p3 = por %p1417_p2, %p1416_p12 }
 0x24a   : > { %p1414_p10 = pneg %p1413_p9 }
 0x24b   : > { %p1420_p7 = por %p1419_p4, %p1418_p3 }
 0x24d   : > { %p1421_p8 = pnand %p1420_p7, %p1414_p10 }
 0x24f   : > { %1424 = shalt.err (!%p1421_p8)
}
 0x250   : > { %1205 = dma.vmem_to_hbm [thread:$0]  (%p1789_p1), %s1706_s13, 16, %s1704_s7, %s935_s26  }
 0x251 PF: > { %p1226_p11 = scmp.ge.s32.totalorder %s1471_s21, 2  ;;  %s972_s14 = sand.u32 1, %s1459_s18  }
 0x252   : > { %p1790_p13 = scmp.ne.s32.totalorder %s1781_s29, 0  ;;  %s973_s15 = scalar_lea.sflag [#allocation4], %s972_s14 }
 0x254   : > { %p1216_p0 = pnand %p1226_p11, %p1790_p13 }
 0x256   : > { %1450 = dma.done.wait (!%p1216_p0), %s973_s15, 128  }
 0x257   : > { %1452 = vsyncadd (!%p1216_p0), %s973_s15, 4294967168  ;;  %s982_s22 = scalar_lea.sflag [#allocation9], %s972_s14 }
 0x258   : > { %1454 = dma.done.wait (!%p1216_p0), %s982_s22, 16  }
 0x259   : > { %1456 = vsyncadd (!%p1216_p0), %s982_s22, 4294967280  ;;  %p21_p1 = scmp.ge.s32.totalorder %s1539_s24, 4   ;;  %s1791_s18 = smov %s1463_s19 }
 0x25a   : > { %s1792_s19 = smov %s1467_s20  ;;  %s1793_s20 = smov %s1550_s27 }
 0x25b   : > { %s1794_s21 = smov %s1539_s24  ;;  %23 = sbr.rel (!%p21_p1) target bundleno = 7 (0x7), region = 97 }
 0x262   :  { %986 = vsyncpa [#allocation3], 1 }
 0x263   :  { %988 = vsyncpa [#allocation3 + $0x1], 1 }
 0x264   :  { %989 = vsyncpa [#allocation6], 1 }
 0x265   :  { %990 = vsyncpa [#allocation4], 1 }
 0x266   :  { %992 = vsyncpa [#allocation4 + $0x1], 1 }
 0x267   :  { %993 = vsyncpa [#allocation9], 1 }
 0x268   :  { %995 = vsyncpa [#allocation9 + $0x1], 1 }

</bundles_post_ra>
